<compile_context>
chip_gen: v6e
topology: v6e:2x2x1
jax: 0.10.0
libtpu: 0.0.40
codegen_flags: <defaults>
</compile_context>

<pallas_src>
import functools

import jax
import jax.numpy as jnp
from jax import lax
from jax.experimental import pallas as pl
from jax.experimental.pallas import tpu as pltpu

_EPS = 1e-5
_LANE = 128                    # lane-dense channel padding


def _chip_limits():
    """Derive (row-tile cap, scoped-VMEM limit) from the attached TPU."""
    try:
        info = pltpu.get_tpu_info()
        cap = int(getattr(info, "vmem_capacity_bytes", 64 << 20))
    except Exception:                       # pragma: no cover - conservative fallback
        cap = 64 << 20
    if cap <= (64 << 20):                   # v7x-class: 64 MiB VMEM per TensorCore
        return 512, min(48 << 20, (cap * 3) // 4)
    return 512, 64 << 20                    # v5e / v6e: 128 MiB physical VMEM


_DEF_TM, _VMEM_LIMIT = _chip_limits()


# ------------------------------ small helpers ------------------------------ #

def _ru(x, m):
    return (x + m - 1) // m * m


def _row_tiling(m):
    """Row-tile size and padded row count for an m-row activation matrix."""
    tm = min(_DEF_TM, _ru(m, 16))        # 16 = bf16 sublane tile
    return tm, _ru(m, tm)


def _pad2d(a, rows, cols):
    r, c = a.shape
    return jnp.pad(a, ((0, rows - r), (0, cols - c)))


def _pad_vec(v, cols):
    return _pad2d(v.reshape(1, -1).astype(jnp.float32), 1, cols)


def _vec_spec(n):
    return pl.BlockSpec((1, n), lambda i: (0, 0))


def _stats_spec(n):
    # per-grid-step partial statistics block: row 0 = sum, row 1 = sum of squares
    return pl.BlockSpec((None, 2, n), lambda i: (i, 0, 0))


def _split_stats(partials):
    """(T, 2, C) per-tile partials -> ((1, C) sum, (1, C) sumsq)."""
    tot = jnp.sum(partials, axis=0)          # tiny XLA reduction
    return tot[0:1, :], tot[1:2, :]


# ------------------------------ Pallas kernels ------------------------------ #

def _matmul_stats_kernel(x_ref, w_ref, y_ref, st_ref):
    """y = x @ w (bf16 in, bf16 out); per-tile per-channel sum / sumsq partials."""
    acc = jnp.dot(x_ref[...], w_ref[...], preferred_element_type=jnp.float32)
    y_ref[...] = acc.astype(y_ref.dtype)
    st_ref[0:1, :] = jnp.sum(acc, axis=0, keepdims=True)
    st_ref[1:2, :] = jnp.sum(acc * acc, axis=0, keepdims=True)


def _bn_act_kernel(y_ref, s1_ref, s2_ref, g_ref, b_ref, o_ref, *, inv_m, relu):
    """Train-mode BN from reduced stats (+ optional ReLU)."""
    mean = s1_ref[...] * inv_m
    var = s2_ref[...] * inv_m - mean * mean
    scale = g_ref[...] * lax.rsqrt(var + _EPS)
    shift = b_ref[...] - mean * scale
    out = y_ref[...].astype(jnp.float32) * scale + shift
    if relu:
        out = jnp.maximum(out, 0.0)
    o_ref[...] = out.astype(o_ref.dtype)


def _conv3x3_stats_kernel(p_ref, w_ref, m_ref, y_ref, st_ref, *, stride, ho, wp_sub):
    """3x3/stride-s conv for one image as 9 shifted matmuls over parity planes.

    p_ref : (1, s*s, hp_sub*wp_sub, Cin)  flattened parity planes (bf16)
    w_ref : (9, Cin, Cout)                per-tap weights (bf16)
    m_ref : (ho*wp_sub, 1)                1.0 on real output columns, 0.0 on junk
    y_ref : (1, ho*wp_sub, Cout)          extended (junk-column) conv output (bf16)
    st_ref: (2, Cout)                     this image's [sum; sumsq] partials (f32)
    """
    s = stride
    rows = ho * wp_sub
    cout = w_ref.shape[-1]
    acc = jnp.zeros((rows, cout), jnp.float32)
    for kh in range(3):
        for kw in range(3):
            plane = (kh % s) * s + (kw % s)
            start = (kh // s) * wp_sub + (kw // s)
            patch = p_ref[0, plane, start:start + rows, :]
            acc = acc + jnp.dot(patch, w_ref[kh * 3 + kw],
                                preferred_element_type=jnp.float32)
    acc = acc * m_ref[...]                    # zero the junk columns
    y_ref[...] = acc[None, :, :].astype(y_ref.dtype)
    st_ref[0:1, :] = jnp.sum(acc, axis=0, keepdims=True)
    st_ref[1:2, :] = jnp.sum(acc * acc, axis=0, keepdims=True)


def _bn_matmul_stats_kernel(y2_ref, s1_ref, s2_ref, g_ref, b_ref, w_ref,
                            y3_ref, st_ref, *, inv_m, m_true, mask_tail):
    """Fused: h2 = relu(bn2(y2)) (VMEM only); y3 = h2 @ w3; bn3 stat partials."""
    i = pl.program_id(0)
    tm = y2_ref.shape[0]
    mean = s1_ref[...] * inv_m
    var = s2_ref[...] * inv_m - mean * mean
    scale = g_ref[...] * lax.rsqrt(var + _EPS)
    shift = b_ref[...] - mean * scale
    h2 = jnp.maximum(y2_ref[...].astype(jnp.float32) * scale + shift, 0.0)
    if mask_tail:
        # only emitted (trace-time) when padded tail rows exist; keeps them from
        # biasing bn3 statistics
        ridx = lax.broadcasted_iota(jnp.int32, (tm, 1), 0) + i * tm
        h2 = jnp.where(ridx < m_true, h2, 0.0)
    acc = jnp.dot(h2.astype(jnp.bfloat16), w_ref[...],
                  preferred_element_type=jnp.float32)
    y3_ref[...] = acc.astype(y3_ref.dtype)
    st_ref[0:1, :] = jnp.sum(acc, axis=0, keepdims=True)
    st_ref[1:2, :] = jnp.sum(acc * acc, axis=0, keepdims=True)


def _bn_residual_relu_kernel(y3_ref, s1_ref, s2_ref, g_ref, b_ref, r_ref, o_ref,
                             *, inv_m):
    """out = relu(bn3(y3) + residual)   (identity shortcut)."""
    mean = s1_ref[...] * inv_m
    var = s2_ref[...] * inv_m - mean * mean
    scale = g_ref[...] * lax.rsqrt(var + _EPS)
    shift = b_ref[...] - mean * scale
    out = (y3_ref[...].astype(jnp.float32) * scale + shift
           + r_ref[...].astype(jnp.float32))
    o_ref[...] = jnp.maximum(out, 0.0).astype(o_ref.dtype)


def _bn_proj_residual_relu_kernel(y3_ref, s1_ref, s2_ref, g_ref, b_ref,
                                  ys_ref, u1_ref, u2_ref, gs_ref, bs_ref,
                                  o_ref, *, inv_m):
    """out = relu(bn3(y3) + bn_s(ys))   (projection shortcut)."""
    mean = s1_ref[...] * inv_m
    var = s2_ref[...] * inv_m - mean * mean
    scale = g_ref[...] * lax.rsqrt(var + _EPS)
    shift = b_ref[...] - mean * scale
    mean_s = u1_ref[...] * inv_m
    var_s = u2_ref[...] * inv_m - mean_s * mean_s
    scale_s = gs_ref[...] * lax.rsqrt(var_s + _EPS)
    shift_s = bs_ref[...] - mean_s * scale_s
    out = ((y3_ref[...].astype(jnp.float32) * scale + shift)
           + (ys_ref[...].astype(jnp.float32) * scale_s + shift_s))
    o_ref[...] = jnp.maximum(out, 0.0).astype(o_ref.dtype)


# ------------------------------ kernel wrappers ------------------------------ #

def matmul_stats(x, w, *, tm):
    mp, k = x.shape
    n = w.shape[1]
    nt = mp // tm
    return pl.pallas_call(
        _matmul_stats_kernel,
        out_shape=(jax.ShapeDtypeStruct((mp, n), jnp.bfloat16),
                   jax.ShapeDtypeStruct((nt, 2, n), jnp.float32)),
        grid_spec=pltpu.PrefetchScalarGridSpec(
            num_scalar_prefetch=0,
            grid=(nt,),
            in_specs=[pl.BlockSpec((tm, k), lambda i: (i, 0)),
                      pl.BlockSpec((k, n), lambda i: (0, 0))],
            out_specs=(pl.BlockSpec((tm, n), lambda i: (i, 0)),
                       _stats_spec(n))),
        compiler_params=pltpu.CompilerParams(
            dimension_semantics=("parallel",),
            vmem_limit_bytes=_VMEM_LIMIT),
        cost_estimate=pl.CostEstimate(
            flops=2 * mp * k * n, transcendentals=0,
            bytes_accessed=(mp * k + k * n + mp * n) * 2),
    )(x, w)


def bn_act(y, s1, s2, g, b, *, inv_m, relu, out_dtype, tm):
    mp, n = y.shape
    kern = functools.partial(_bn_act_kernel, inv_m=inv_m, relu=relu)
    return pl.pallas_call(
        kern,
        out_shape=jax.ShapeDtypeStruct((mp, n), out_dtype),
        grid_spec=pltpu.PrefetchScalarGridSpec(
            num_scalar_prefetch=0,
            grid=(mp // tm,),
            in_specs=[pl.BlockSpec((tm, n), lambda i: (i, 0)),
                      _vec_spec(n), _vec_spec(n), _vec_spec(n), _vec_spec(n)],
            out_specs=pl.BlockSpec((tm, n), lambda i: (i, 0))),
        compiler_params=pltpu.CompilerParams(
            dimension_semantics=("parallel",),
            vmem_limit_bytes=_VMEM_LIMIT),
        cost_estimate=pl.CostEstimate(
            flops=4 * mp * n, transcendentals=n,
            bytes_accessed=mp * n * 2 + mp * n * jnp.dtype(out_dtype).itemsize),
    )(y, s1, s2, g, b)


def conv3x3_stats(planes_arr, w2, colmask, *, stride, ho, wp_sub):
    nb, ss, hw, cin = planes_arr.shape
    cout = w2.shape[-1]
    rows = ho * wp_sub
    kern = functools.partial(_conv3x3_stats_kernel, stride=stride, ho=ho,
                             wp_sub=wp_sub)
    return pl.pallas_call(
        kern,
        out_shape=(jax.ShapeDtypeStruct((nb, rows, cout), jnp.bfloat16),
                   jax.ShapeDtypeStruct((nb, 2, cout), jnp.float32)),
        grid_spec=pltpu.PrefetchScalarGridSpec(
            num_scalar_prefetch=0,
            grid=(nb,),
            in_specs=[pl.BlockSpec((1, ss, hw, cin), lambda i: (i, 0, 0, 0)),
                      pl.BlockSpec((9, cin, cout), lambda i: (0, 0, 0)),
                      pl.BlockSpec((rows, 1), lambda i: (0, 0))],
            out_specs=(pl.BlockSpec((1, rows, cout), lambda i: (i, 0, 0)),
                       _stats_spec(cout))),
        compiler_params=pltpu.CompilerParams(
            dimension_semantics=("parallel",),
            vmem_limit_bytes=_VMEM_LIMIT),
        cost_estimate=pl.CostEstimate(
            flops=2 * 9 * nb * rows * cin * cout, transcendentals=0,
            bytes_accessed=(planes_arr.size + w2.size + nb * rows * cout) * 2),
    )(planes_arr, w2, colmask)


def bn_matmul_stats(y2, s1, s2, g, b, w3, *, inv_m, m_true, tm):
    mp, cin = y2.shape
    cout = w3.shape[1]
    nt = mp // tm
    kern = functools.partial(_bn_matmul_stats_kernel, inv_m=inv_m, m_true=m_true,
                             mask_tail=(mp != m_true))
    return pl.pallas_call(
        kern,
        out_shape=(jax.ShapeDtypeStruct((mp, cout), jnp.bfloat16),
                   jax.ShapeDtypeStruct((nt, 2, cout), jnp.float32)),
        grid_spec=pltpu.PrefetchScalarGridSpec(
            num_scalar_prefetch=0,
            grid=(nt,),
            in_specs=[pl.BlockSpec((tm, cin), lambda i: (i, 0)),
                      _vec_spec(cin), _vec_spec(cin), _vec_spec(cin), _vec_spec(cin),
                      pl.BlockSpec((cin, cout), lambda i: (0, 0))],
            out_specs=(pl.BlockSpec((tm, cout), lambda i: (i, 0)),
                       _stats_spec(cout))),
        compiler_params=pltpu.CompilerParams(
            dimension_semantics=("parallel",),
            vmem_limit_bytes=_VMEM_LIMIT),
        cost_estimate=pl.CostEstimate(
            flops=2 * mp * cin * cout + 5 * mp * cin, transcendentals=cin,
            bytes_accessed=mp * cin * 2 + cin * cout * 2 + mp * cout * 2),
    )(y2, s1, s2, g, b, w3)


def bn_residual_relu(y3, s1, s2, g, b, res, *, inv_m, tm):
    mp, n = y3.shape
    kern = functools.partial(_bn_residual_relu_kernel, inv_m=inv_m)
    return pl.pallas_call(
        kern,
        out_shape=jax.ShapeDtypeStruct((mp, n), jnp.float32),
        grid_spec=pltpu.PrefetchScalarGridSpec(
            num_scalar_prefetch=0,
            grid=(mp // tm,),
            in_specs=[pl.BlockSpec((tm, n), lambda i: (i, 0)),
                      _vec_spec(n), _vec_spec(n), _vec_spec(n), _vec_spec(n),
                      pl.BlockSpec((tm, n), lambda i: (i, 0))],
            out_specs=pl.BlockSpec((tm, n), lambda i: (i, 0))),
        compiler_params=pltpu.CompilerParams(
            dimension_semantics=("parallel",),
            vmem_limit_bytes=_VMEM_LIMIT),
        cost_estimate=pl.CostEstimate(
            flops=5 * mp * n, transcendentals=n, bytes_accessed=mp * n * 8),
    )(y3, s1, s2, g, b, res)


def bn_proj_residual_relu(y3, s1, s2, g, b, ys, u1, u2, gs, bs, *, inv_m, tm):
    mp, n = y3.shape
    kern = functools.partial(_bn_proj_residual_relu_kernel, inv_m=inv_m)
    return pl.pallas_call(
        kern,
        out_shape=jax.ShapeDtypeStruct((mp, n), jnp.float32),
        grid_spec=pltpu.PrefetchScalarGridSpec(
            num_scalar_prefetch=0,
            grid=(mp // tm,),
            in_specs=[pl.BlockSpec((tm, n), lambda i: (i, 0)),
                      _vec_spec(n), _vec_spec(n), _vec_spec(n), _vec_spec(n),
                      pl.BlockSpec((tm, n), lambda i: (i, 0)),
                      _vec_spec(n), _vec_spec(n), _vec_spec(n), _vec_spec(n)],
            out_specs=pl.BlockSpec((tm, n), lambda i: (i, 0))),
        compiler_params=pltpu.CompilerParams(
            dimension_semantics=("parallel",),
            vmem_limit_bytes=_VMEM_LIMIT),
        cost_estimate=pl.CostEstimate(
            flops=9 * mp * n, transcendentals=2 * n, bytes_accessed=mp * n * 8),
    )(y3, s1, s2, g, b, ys, u1, u2, gs, bs)


# --------------------------------- module ----------------------------------- #

class BottleneckPallas:
    expansion = 4

    def __init__(self, in_planes, planes, stride=1, *, key):
        self.in_planes, self.planes, self.stride = in_planes, planes, stride
        out_planes = self.expansion * planes
        ks = jax.random.split(key, 8)

        def bf16ish(a):  # keep params bf16-representable (kernel uses bf16 MXU operands)
            return a.astype(jnp.bfloat16).astype(jnp.float32)

        # conv weights kept in PyTorch OIHW layout
        self.w1 = bf16ish(0.2 * jax.random.normal(ks[0], (planes, in_planes, 1, 1), jnp.float32))
        self.w2 = bf16ish(0.2 * jax.random.normal(ks[1], (planes, planes, 3, 3), jnp.float32))
        self.w3 = bf16ish(0.2 * jax.random.normal(ks[2], (out_planes, planes, 1, 1), jnp.float32))
        # BatchNorm affine parameters
        self.g1 = 1.0 + 0.1 * jax.random.normal(ks[3], (planes,), jnp.float32)
        self.b1 = 0.1 * jax.random.normal(ks[4], (planes,), jnp.float32)
        self.g2 = 1.0 + 0.1 * jax.random.normal(ks[5], (planes,), jnp.float32)
        self.b2 = 0.1 * jax.random.normal(ks[6], (planes,), jnp.float32)
        kk = jax.random.split(ks[7], 6)
        self.g3 = 1.0 + 0.1 * jax.random.normal(kk[0], (out_planes,), jnp.float32)
        self.b3 = 0.1 * jax.random.normal(kk[1], (out_planes,), jnp.float32)
        self.has_shortcut = (stride != 1) or (in_planes != out_planes)
        if self.has_shortcut:
            self.ws = bf16ish(0.2 * jax.random.normal(kk[2], (out_planes, in_planes, 1, 1), jnp.float32))
            self.gs = 1.0 + 0.1 * jax.random.normal(kk[3], (out_planes,), jnp.float32)
            self.bs = 0.1 * jax.random.normal(kk[4], (out_planes,), jnp.float32)

    # weights reshaped for the matmul kernels
    @property
    def w1_mm(self):                                   # (Cin, P)
        return self.w1[:, :, 0, 0].T

    @property
    def w3_mm(self):                                   # (P, 4P)
        return self.w3[:, :, 0, 0].T

    @property
    def ws_mm(self):                                   # (Cin, 4P)
        return self.ws[:, :, 0, 0].T

    @property
    def w2_taps(self):                                 # (9, Cin, Cout), tap = kh*3+kw
        return jnp.transpose(self.w2, (2, 3, 1, 0)).reshape(9, self.planes, self.planes)

    def __call__(self, x_nchw):
        n, c, h, w = x_nchw.shape
        s = self.stride
        p = self.planes
        op = self.expansion * p
        cp, pp, opp = _ru(c, _LANE), _ru(p, _LANE), _ru(op, _LANE)

        ho = (h - 1) // s + 1
        wo = (w - 1) // s + 1
        m1, m2 = n * h * w, n * ho * wo
        tm1, m1p = _row_tiling(m1)
        tm2, m2p = _row_tiling(m2)

        x = jnp.transpose(x_nchw, (0, 2, 3, 1))                  # NCHW -> NHWC

        # ---- stage 1: 1x1 conv (+ bn1 stat partials), then bn1+relu -> h1 (bf16) ----
        x2d = _pad2d(x.reshape(m1, c).astype(jnp.bfloat16), m1p, cp)
        w1p = _pad2d(self.w1_mm, cp, pp).astype(jnp.bfloat16)
        y1, p1 = matmul_stats(x2d, w1p, tm=tm1)
        a1, q1 = _split_stats(p1)
        h1 = bn_act(y1, a1, q1, _pad_vec(self.g1, pp), _pad_vec(self.b1, pp),
                    inv_m=1.0 / m1, relu=True, out_dtype=jnp.bfloat16, tm=tm1)
        h1 = h1[:m1].reshape(n, h, w, pp)

        # ---- stage 2: 3x3 stride-s conv as 9 shifted matmuls over parity planes ----
        # TODO(synk): fuse bn1+relu here (with a border mask) to drop the pad/relayout pass.
        off = 2 // s                            # max tap block-offset per spatial axis
        wp_sub = max(wo + off, -(-(w + 2) // s))
        hp_sub = max(ho + off + 1, -(-(h + 2) // s))   # +1 row of slack for column wrap
        xp = jnp.pad(h1, ((0, 0), (1, s * hp_sub - h - 1),
                          (1, s * wp_sub - w - 1), (0, 0)))
        planes_arr = xp.reshape(n, hp_sub, s, wp_sub, s, pp)
        planes_arr = planes_arr.transpose(0, 2, 4, 1, 3, 5).reshape(
            n, s * s, hp_sub * wp_sub, pp)
        w2p = jnp.pad(self.w2_taps,
                      ((0, 0), (0, pp - p), (0, pp - p))).astype(jnp.bfloat16)
        rows = ho * wp_sub
        colmask = (jnp.arange(rows) % wp_sub < wo).astype(jnp.float32).reshape(rows, 1)
        y2e, p2 = conv3x3_stats(planes_arr, w2p, colmask,
                                stride=s, ho=ho, wp_sub=wp_sub)
        a2, q2 = _split_stats(p2)
        # drop the junk columns of the extended output grid -> compact (m2p, pp) bf16
        y2 = y2e.reshape(n, ho, wp_sub, pp)[:, :, :wo, :].reshape(m2, pp)
        y2 = _pad2d(y2, m2p, pp)

        # ---- shortcut branch ----
        if self.has_shortcut:
            # TODO(synk): the strided spatial gather is JAX glue; it could be folded
            # into the matmul kernel with an element-indexed BlockSpec.
            xs = x[:, ::s, ::s, :].reshape(m2, c).astype(jnp.bfloat16)
            xs = _pad2d(xs, m2p, cp)
            wsp = _pad2d(self.ws_mm, cp, opp).astype(jnp.bfloat16)
            ys, ps = matmul_stats(xs, wsp, tm=tm2)
            ua, ub = _split_stats(ps)
        else:
            res = _pad2d(x.reshape(m2, c).astype(jnp.bfloat16), m2p, opp)  # c == op here

        # ---- fused: bn2+relu -> 1x1 conv3 (+ bn3 stat partials); h2 never hits HBM ----
        w3p = _pad2d(self.w3_mm, pp, opp).astype(jnp.bfloat16)
        y3, p3 = bn_matmul_stats(
            y2, a2, q2, _pad_vec(self.g2, pp), _pad_vec(self.b2, pp), w3p,
            inv_m=1.0 / m2, m_true=m2, tm=tm2)
        t1, t2 = _split_stats(p3)

        # ---- fused: bn3 (+ shortcut BN) + residual add + relu ----
        if self.has_shortcut:
            out = bn_proj_residual_relu(
                y3, t1, t2, _pad_vec(self.g3, opp), _pad_vec(self.b3, opp),
                ys, ua, ub, _pad_vec(self.gs, opp), _pad_vec(self.bs, opp),
                inv_m=1.0 / m2, tm=tm2)
        else:
            out = bn_residual_relu(
                y3, t1, t2, _pad_vec(self.g3, opp), _pad_vec(self.b3, opp),
                res, inv_m=1.0 / m2, tm=tm2)

        out = out[:m2, :op].reshape(n, ho, wo, op)
        return jnp.transpose(out, (0, 3, 1, 2))                  # NHWC -> NCHW


# ----------------------------- pure-JAX reference ---------------------------- #

def _bn_train(x_nchw, gamma, beta):
    mean = jnp.mean(x_nchw, axis=(0, 2, 3), keepdims=True)
    var = jnp.mean((x_nchw - mean) ** 2, axis=(0, 2, 3), keepdims=True)
    return ((x_nchw - mean) / jnp.sqrt(var + _EPS)
            * gamma.reshape(1, -1, 1, 1) + beta.reshape(1, -1, 1, 1))


def reference_forward(block, x):
    def conv(x, w, stride=1, pad=0):
        return lax.conv_general_dilated(
            x, w, (stride, stride), [(pad, pad), (pad, pad)],
            dimension_numbers=("NCHW", "OIHW", "NCHW"))
    out = jax.nn.relu(_bn_train(conv(x, block.w1), block.g1, block.b1))
    out = jax.nn.relu(_bn_train(conv(out, block.w2, stride=block.stride, pad=1),
                                block.g2, block.b2))
    out = _bn_train(conv(out, block.w3), block.g3, block.b3)
    if block.has_shortcut:
        sc = _bn_train(conv(x, block.ws, stride=block.stride), block.gs, block.bs)
    else:
        sc = x
    return jax.nn.relu(out + sc)


# ------------------------------------ main ----------------------------------- #

if __name__ == "__main__":
    key = jax.random.PRNGKey(0)
    kp1, kp2, kx1, kx2 = jax.random.split(key, 4)

    # Case A: projection shortcut (stride 2, in_planes != expansion*planes)
    block_a = BottleneckPallas(16, 8, stride=2, key=kp1)
    xa = jax.random.normal(kx1, (2, 16, 8, 8), jnp.float32)
    xa = xa.astype(jnp.bfloat16).astype(jnp.float32)   # bf16-representable inputs
    out_a = jax.block_until_ready(block_a(xa))
    ref_a = jax.block_until_ready(reference_forward(block_a, xa))
    assert out_a.shape == (2, 32, 4, 4), out_a.shape
    assert bool(jnp.all(jnp.isfinite(out_a)))
    err_a = float(jnp.max(jnp.abs(out_a - ref_a)))
    # tolerance accounts for bf16 MXU operands and bf16-stored intermediates
    # through three BN-normalised stages
    assert err_a < 1e-1, f"projection-shortcut max_err={err_a}"

    # Case B: identity shortcut (stride 1, in_planes == expansion*planes)
    block_b = BottleneckPallas(32, 8, stride=1, key=kp2)
    xb = jax.random.normal(kx2, (2, 32, 8, 8), jnp.float32)
    xb = xb.astype(jnp.bfloat16).astype(jnp.float32)
    out_b = jax.block_until_ready(block_b(xb))
    ref_b = jax.block_until_ready(reference_forward(block_b, xb))
    assert out_b.shape == (2, 32, 8, 8), out_b.shape
    assert bool(jnp.all(jnp.isfinite(out_b)))
    err_b = float(jnp.max(jnp.abs(out_b - ref_b)))
    assert err_b < 1e-1, f"identity-shortcut max_err={err_b}"

    print("KERNEL_OK")
</pallas_src>

<mosaic_0001>
module attributes {stable_mosaic.version = 11 : i64} {
  func.func @_matmul_stats_kernel(%arg0: i32, %arg1: memref<128x128xbf16, #tpu.memory_space<vmem>>, %arg2: memref<128x128xbf16, #tpu.memory_space<vmem>>, %arg3: memref<128x128xbf16, #tpu.memory_space<vmem>>, %arg4: memref<1x2x128xf32, #tpu.memory_space<vmem>>) attributes {dimension_semantics = [#tpu.dimension_semantics<parallel>], iteration_bounds = array<i64: 1>, scalar_prefetch = 0 : i64, scratch_operands = 0 : i64, tpu.core_type = #tpu.core_type<tc>, window_params = [{transform_indices = @transform_0, window_bounds = array<i64: 128, 128>}, {pipeline_mode = #tpu.pipeline_mode<synchronous>, transform_indices = @transform_1, window_bounds = array<i64: 128, 128>}, {transform_indices = @transform_2, window_bounds = array<i64: 128, 128>}, {transform_indices = @transform_3, window_bounds = array<i64: 1, 2, 128>}]} {
    %c0 = arith.constant 0 : index
    %c0_0 = arith.constant 0 : index
    %0 = vector.load %arg1[%c0, %c0_0] : memref<128x128xbf16, #tpu.memory_space<vmem>>, vector<128x128xbf16>
    %c0_1 = arith.constant 0 : index
    %c0_2 = arith.constant 0 : index
    %1 = vector.load %arg2[%c0_1, %c0_2] : memref<128x128xbf16, #tpu.memory_space<vmem>>, vector<128x128xbf16>
    %cst = arith.constant dense<0.000000e+00> : vector<128x128xf32>
    %2 = tpu.matmul %0, %1, %cst {dimension_numbers = #tpu.dot_dimension_numbers<[1], [0], [0], [1], [0, 0, 1, 1], [], []>} : vector<128x128xbf16>, vector<128x128xbf16>, vector<128x128xf32> -> vector<128x128xf32>
    %3 = arith.truncf %2 : vector<128x128xf32> to vector<128x128xbf16>
    %c0_3 = arith.constant 0 : index
    %c0_4 = arith.constant 0 : index
    %4 = vector.load %arg3[%c0_3, %c0_4] : memref<128x128xbf16, #tpu.memory_space<vmem>>, vector<128x128xbf16>
    tpu.vector_store %arg3[%c0_3, %c0_4], %3 {strides = array<i32>} : memref<128x128xbf16, #tpu.memory_space<vmem>>, vector<128x128xbf16>,
    %cst_5 = arith.constant dense<0.000000e+00> : vector<128xf32>
    %5 = vector.multi_reduction <add>, %2, %cst_5 [0] : vector<128x128xf32> to vector<128xf32>
    %6 = vector.shape_cast %5 : vector<128xf32> to vector<1x128xf32>
    %c0_6 = arith.constant 0 : index
    %c0_7 = arith.constant 0 : index
    %c0_8 = arith.constant 0 : index
    %7 = vector.load %arg4[%c0_6, %c0_7, %c0_8] : memref<1x2x128xf32, #tpu.memory_space<vmem>>, vector<1x1x128xf32>
    %8 = vector.shape_cast %7 : vector<1x1x128xf32> to vector<1x128xf32>
    %9 = vector.shape_cast %6 : vector<1x128xf32> to vector<1x1x128xf32>
    tpu.vector_store %arg4[%c0_6, %c0_7, %c0_8], %9 {strides = array<i32>} : memref<1x2x128xf32, #tpu.memory_space<vmem>>, vector<1x1x128xf32>,
    %10 = arith.mulf %2, %2 : vector<128x128xf32>
    %cst_9 = arith.constant dense<0.000000e+00> : vector<128xf32>
    %11 = vector.multi_reduction <add>, %10, %cst_9 [0] : vector<128x128xf32> to vector<128xf32>
    %12 = vector.shape_cast %11 : vector<128xf32> to vector<1x128xf32>
    %c0_10 = arith.constant 0 : index
    %c1 = arith.constant 1 : index
    %c0_11 = arith.constant 0 : index
    %13 = vector.load %arg4[%c0_10, %c1, %c0_11] : memref<1x2x128xf32, #tpu.memory_space<vmem>>, vector<1x1x128xf32>
    %14 = vector.shape_cast %13 : vector<1x1x128xf32> to vector<1x128xf32>
    %15 = vector.shape_cast %12 : vector<1x128xf32> to vector<1x1x128xf32>
    tpu.vector_store %arg4[%c0_10, %c1, %c0_11], %15 {strides = array<i32>} : memref<1x2x128xf32, #tpu.memory_space<vmem>>, vector<1x1x128xf32>,
    return
  }
  func.func @transform_0(%arg0: i32) -> (i32, i32) {
    %c0_i32 = arith.constant 0 : i32
    %c0_i32_0 = arith.constant 0 : i32
    return %arg0, %c0_i32 : i32, i32
  }
  func.func @transform_1(%arg0: i32) -> (i32, i32) {
    %c0_i32 = arith.constant 0 : i32
    %c0_i32_0 = arith.constant 0 : i32
    %c0_i32_1 = arith.constant 0 : i32
    return %c0_i32, %c0_i32_0 : i32, i32
  }
  func.func @transform_2(%arg0: i32) -> (i32, i32) {
    %c0_i32 = arith.constant 0 : i32
    %c0_i32_0 = arith.constant 0 : i32
    return %arg0, %c0_i32 : i32, i32
  }
  func.func @transform_3(%arg0: i32) -> (i32, i32, i32) {
    %c0_i32 = arith.constant 0 : i32
    %c0_i32_0 = arith.constant 0 : i32
    %c0_i32_1 = arith.constant 0 : i32
    return %arg0, %c0_i32, %c0_i32_0 : i32, i32, i32
  }
}

</mosaic_0001>

<bundles_post_ra>
// kernel: tpu_custom_call.1
= control target key start
LH: loop header
LB: loop body
LE: loop exit
PB: predicated region body
PF: predicated region fallthrough
CT: control target
= control target key end

     0   :  { %9 = vsyncpa [#allocation3], 0  ;;  %s781_s0 = inlined_call_operand.hbm [shape: bf16[128,128], index: 0, kind: input, shape index: {}]   ;;  %s782_s1 = inlined_call_operand.hbm [shape: bf16[128,128], index: 1, kind: input, shape index: {}]   ;;  %s783_s2 = inlined_call_operand.hbm [shape: bf16[128,128], index: 2, kind: output, shape index: {0}]   ;;  %s784_s3 = inlined_call_operand.hbm [shape: f32[1,2,128], index: 3, kind: output, shape index: {1}]  }
   0x1   :  { %10 = vsyncpa [#allocation6], 0 }
   0x2   :  { %11 = vsyncpa [#allocation4], 0 }
   0x3   :  { %12 = vsyncpa [#allocation9], 0  ;;  %s710_s12 = smov [#allocation2]  }
   0x4   :  { %s18_s13 = sshll.u32 %s710_s12, 4  ;;  %s19_s13 = int_to_ptr.vmem [resolvable:$true] %s18_s13 }
   0x5   :  { %s630_s14 = scalar_lea.vmem %s19_s13, 1024  ;;  %p635_p1 = scmp.lt.s32.totalorder %s19_s13, %s19_s13 }
   0x6   :  { %p631_p0 = scmp.ne.s32.totalorder %s19_s13, %s630_s14  ;;  %p636_p2 = scmp.lt.s32.totalorder %s630_s14, %s630_s14 }
   0x8   :  { %p637_p3 = por %p636_p2, %p635_p1 }
   0xa   :  { %p638_p4 = pnand %p637_p3, %p631_p0 }
   0xc   :  { %641 = shalt.err (!%p638_p4)
}
   0xd   :  { %s711_s15 = smov 64   ;;  %s712_s16 = smov 4  }
   0xe   :  { %24 = dma.hbm_to_vmem [thread:$0]  %s781_s0, 1024, %s19_s13, [#allocation3], %s711_s15, %s711_s15, %s712_s16  }
   0xf   :  { %s713_s19 = smov [#allocation5]  }
  0x10   :  { %s30_s20 = sshll.u32 %s713_s19, 4  ;;  %s31_s20 = int_to_ptr.vmem [resolvable:$true] %s30_s20 }
  0x11   :  { %s650_s21 = scalar_lea.vmem %s31_s20, 1024  ;;  %p655_p6 = scmp.lt.s32.totalorder %s31_s20, %s31_s20 }
  0x12   :  { %p651_p5 = scmp.ne.s32.totalorder %s31_s20, %s650_s21  ;;  %p656_p7 = scmp.lt.s32.totalorder %s650_s21, %s650_s21 }
  0x14   :  { %p657_p8 = por %p656_p7, %p655_p6 }
  0x16   :  { %p658_p9 = pnand %p657_p8, %p651_p5 }
  0x18   :  { %661 = shalt.err (!%p658_p9)
}
  0x19   :  { %36 = dma.hbm_to_vmem [thread:$0]  %s782_s1, 1024, %s31_s20, [#allocation6], %s711_s15, %s711_s15, %s712_s16  }
  0x1a   :  { %702 = dma.done.wait [#allocation3], 1024  }
  0x1b   :  { %703 = vsyncadd [#allocation3], 4294966272 }
  0x1c   :  { %704 = dma.done.wait [#allocation6], 1024  }
  0x1d   :  { %705 = vsyncadd [#allocation6], 4294966272  ;;  %v606_v0 = vld [vmem:[#allocation5 + $0x38] sm:$0xff]   ;;  %v607_v1 = vld [vmem:[#allocation5 + $0x30] sm:$0xff]   ;;  %s714_s0 = smov [#allocation7]  }
  0x1e   :  { %552 = vmatprep.subr.bf16.mxu0 %v606_v0  ;;  %584 = vmatprep.subr.bf16.mxu1 %v606_v0  ;;  %v608_v2 = vld [vmem:[#allocation5 + $0x28] sm:$0xff]   ;;  %v609_v3 = vld [vmem:[#allocation5 + $0x20] sm:$0xff]   ;;  %v610_v5 = vld [vmem:[#allocation5 + $0x18] sm:$0xff]   ;;  %s414_s1 = sshll.u32 %s714_s0, 4  ;;  %s415_s1 = int_to_ptr.vmem [resolvable:$true] %s414_s1 }
  0x1f   :  { %553 = vmatpush3.bf16.msra.mxu0 %v606_v0  ;;  %592 = vmatpush3.bf16.msra.mxu1 %v606_v0  ;;  %v614_v4 = vld [vmem:[#allocation2] sm:$0xff]   ;;  %v611_v7 = vld [vmem:[#allocation5 + $0x10] sm:$0xff]   ;;  %v612_v8 = vld [vmem:[#allocation5 + $0x8] sm:$0xff]   ;;  %s662_s24 = scalar_lea.vmem %s415_s1, 1024  ;;  %p667_p11 = scmp.lt.s32.totalorder %s415_s1, %s415_s1 }
  0x20   :  { %554 = vmatprep.subr.bf16.mxu0 %v607_v1  ;;  %585 = vmatprep.subr.bf16.mxu1 %v607_v1  ;;  %v618_v6 = vld [vmem:[#allocation2 + $0x20] sm:$0xff]   ;;  %v615_v10 = vld [vmem:[#allocation2 + $0x8] sm:$0xff]   ;;  %v616_v12 = vld [vmem:[#allocation2 + $0x10] sm:$0xff]   ;;  %p663_p10 = scmp.ne.s32.totalorder %s415_s1, %s662_s24  ;;  %p668_p12 = scmp.lt.s32.totalorder %s662_s24, %s662_s24 }
  0x21   :  { %568 = vmatprep.mubr.bf16.mxu0 %v614_v4  ;;  %576 = vmatprep.mubr.bf16.mxu1 %v618_v6  ;;  %v613_v9 = vld [vmem:[#allocation5] sm:$0xff]   ;;  %v619_v11 = vld [vmem:[#allocation2 + $0x28] sm:$0xff]   ;;  %v620_v13 = vld [vmem:[#allocation2 + $0x30] sm:$0xff]  }
  0x22   :  { %v617_v14 = vld [vmem:[#allocation2 + $0x18] sm:$0xff]   ;;  %p669_p13 = por %p668_p12, %p667_p11 }
  0x23   :  { %555 = vmatpush3.bf16.msra.mxu0 %v607_v1  ;;  %593 = vmatpush3.bf16.msra.mxu1 %v607_v1  ;;  %v621_v15 = vld [vmem:[#allocation2 + $0x38] sm:$0xff]  }
  0x24   :  { %556 = vmatprep.subr.bf16.mxu0 %v608_v2  ;;  %586 = vmatprep.subr.bf16.mxu1 %v608_v2  ;;  %p670_p0 = pnand %p669_p13, %p663_p10 }
  0x27   :  { %557 = vmatpush3.bf16.msra.mxu0 %v608_v2  ;;  %594 = vmatpush3.bf16.msra.mxu1 %v608_v2 }
  0x28   :  { %558 = vmatprep.subr.bf16.mxu0 %v609_v3  ;;  %587 = vmatprep.subr.bf16.mxu1 %v609_v3 }
  0x2b   :  { %559 = vmatpush3.bf16.msra.mxu0 %v609_v3  ;;  %595 = vmatpush3.bf16.msra.mxu1 %v609_v3 }
  0x2c   :  { %560 = vmatprep.subr.bf16.mxu0 %v610_v5  ;;  %588 = vmatprep.subr.bf16.mxu1 %v610_v5 }
  0x2f   :  { %561 = vmatpush3.bf16.msra.mxu0 %v610_v5  ;;  %596 = vmatpush3.bf16.msra.mxu1 %v610_v5 }
  0x30   :  { %562 = vmatprep.subr.bf16.mxu0 %v611_v7  ;;  %589 = vmatprep.subr.bf16.mxu1 %v611_v7 }
  0x33   :  { %563 = vmatpush3.bf16.msra.mxu0 %v611_v7  ;;  %597 = vmatpush3.bf16.msra.mxu1 %v611_v7 }
  0x34   :  { %564 = vmatprep.subr.bf16.mxu0 %v612_v8  ;;  %590 = vmatprep.subr.bf16.mxu1 %v612_v8 }
  0x37   :  { %565 = vmatpush3.bf16.msra.mxu0 %v612_v8  ;;  %598 = vmatpush3.bf16.msra.mxu1 %v612_v8 }
  0x38   :  { %566 = vmatprep.subr.bf16.mxu0 %v613_v9  ;;  %591 = vmatprep.subr.bf16.mxu1 %v613_v9 }
  0x3b   :  { %567 = vmatpush3.bf16.msra.mxu0 %v613_v9  ;;  %599 = vmatpush3.bf16.msra.mxu1 %v613_v9 }
  0x3e   :  { %569 = vmatmul.mubr.bf16.vlgmr.msra.gmra.mxu0 %v615_v10  ;;  %577 = vmatmul.mubr.bf16.vlgmr.msra.gmra.mxu1 %v619_v11 }
  0x3f   :  { %572 = vmatprep.mubr.bf16.mxu0 %v616_v12  ;;  %580 = vmatprep.mubr.bf16.mxu1 %v620_v13 }
  0x46   :  { %573 = vmatmul.mubr.bf16.gmra.mxu0 %v617_v14  ;;  %581 = vmatmul.mubr.bf16.gmra.mxu1 %v621_v15 }
  0xfe   :  { %v570_v16 = vpop.f32.mrf.mxu0  ;;  %v748_v17 = vpop.f32.mrf.mxu1 }
  0xff   :  { %v373_v33 = vmul.f32 %v570_v16, %v570_v16 }
 0x100   :  { %v206_v18 = vpop.f32.mrf.mxu0  ;;  %v750_v19 = vpop.f32.mrf.mxu1 }
 0x101   :  { %v371_v24 = vmul.f32 %v206_v18, %v206_v18 }
 0x102   :  { %v571_v20 = vpop.f32.mrf.mxu0  ;;  %v752_v21 = vpop.f32.mrf.mxu1 }
 0x103   :  { %v497_v22 = vpack.c.bf16 %v571_v20, %v570_v16  ;;  %v517_v23 = vpack.c.bf16 %v752_v21, %v748_v17  ;;  %v374_v38 = vmul.f32 %v571_v20, %v571_v20 }
 0x104   :  { %v209_v25 = vpop.f32.mrf.mxu0  ;;  %v241_v26 = vpop.f32.mrf.mxu1 }
 0x105   :  { %529 = vst [vmem:[#allocation7 + $0x8] sm:$0xff] %v497_v22   ;;  %v492_v27 = vpack.c.bf16 %v209_v25, %v206_v18  ;;  %v349_v28 = vadd.f32 %v209_v25, %v206_v18  ;;  %v372_v29 = vmul.f32 %v209_v25, %v209_v25  ;;  %533 = vst [vmem:[#allocation7 + $0x28] sm:$0xff] %v517_v23  }
 0x106   :  { %v512_v30 = vpack.c.bf16 %v241_v26, %v750_v19  ;;  %v574_v31 = vpop.f32.mrf.mxu0  ;;  %v757_v32 = vpop.f32.mrf.mxu1 }
 0x107   :  { %493 = vst [vmem:[#allocation7] sm:$0xff] %v492_v27   ;;  %v350_v34 = vadd.f32 %v570_v16, %v349_v28  ;;  %v387_v35 = vadd.f32 %v372_v29, %v371_v24  ;;  %v377_v55 = vmul.f32 %v574_v31, %v574_v31 }
 0x108   :  { %532 = vst [vmem:[#allocation7 + $0x20] sm:$0xff] %v512_v30   ;;  %v222_v36 = vpop.f32.mrf.mxu0  ;;  %v254_v37 = vpop.f32.mrf.mxu1 }
 0x109   :  { %v388_v39 = vadd.f32 %v387_v35, %v373_v33  ;;  %v351_v40 = vadd.f32 %v571_v20, %v350_v34  ;;  %v375_v44 = vmul.f32 %v222_v36, %v222_v36 }
 0x10a   :  { %v575_v41 = vpop.f32.mrf.mxu0  ;;  %v583_v42 = vpop.f32.mrf.mxu1 }
 0x10b   :  { %v352_v43 = vadd.f32 %v351_v40, %v222_v36  ;;  %v389_v45 = vadd.f32 %v388_v39, %v374_v38  ;;  %v507_v46 = vpack.c.bf16 %v575_v41, %v574_v31  ;;  %v527_v48 = vpack.c.bf16 %v583_v42, %v757_v32 }
 0x10c   :  { %v225_v47 = vpop.f32.mrf.mxu0  ;;  %v257_v49 = vpop.f32.mrf.mxu1  ;;  %v378_v58 = vmul.f32 %v575_v41, %v575_v41 }
 0x10d   :  { %v390_v50 = vadd.f32 %v389_v45, %v375_v44  ;;  %531 = vst [vmem:[#allocation7 + $0x18] sm:$0xff] %v507_v46   ;;  %v502_v51 = vpack.c.bf16 %v225_v47, %v222_v36  ;;  %v353_v52 = vadd.f32 %v352_v43, %v225_v47  ;;  %v376_v53 = vmul.f32 %v225_v47, %v225_v47 }
 0x10e   :  { %535 = vst [vmem:[#allocation7 + $0x38] sm:$0xff] %v527_v48   ;;  %v522_v54 = vpack.c.bf16 %v257_v49, %v254_v37 }
 0x10f   :  { %530 = vst [vmem:[#allocation7 + $0x10] sm:$0xff] %v502_v51   ;;  %v354_v56 = vadd.f32 %v574_v31, %v353_v52  ;;  %v391_v57 = vadd.f32 %v390_v50, %v376_v53 }
 0x110   :  { %534 = vst [vmem:[#allocation7 + $0x30] sm:$0xff] %v522_v54  }
 0x111   :  { %v355_v59 = vadd.f32 %v575_v41, %v354_v56  ;;  %v392_v60 = vadd.f32 %v391_v57, %v377_v55 }
 0x112   :  { %673 = shalt.err (!%p670_p0)
}
 0x113   :  { %420 = dma.vmem_to_hbm [thread:$0]  %s415_s1, 1024, %s783_s2, [#allocation4], %s711_s15, %s711_s15, %s712_s16   ;;  %v379_v61 = vmul.f32 %v750_v19, %v750_v19  ;;  %v393_v62 = vadd.f32 %v392_v60, %v378_v58  ;;  %v356_v63 = vadd.f32 %v355_v59, %v750_v19  ;;  %v380_v1 = vmul.f32 %v241_v26, %v241_v26 }
 0x114   :  { %v381_v3 = vmul.f32 %v748_v17, %v748_v17  ;;  %v382_v6 = vmul.f32 %v752_v21, %v752_v21  ;;  %v383_v10 = vmul.f32 %v254_v37, %v254_v37  ;;  %v384_v14 = vmul.f32 %v257_v49, %v257_v49  ;;  %s715_s2 = smov [#allocation8]  }
 0x115   :  { %v357_v0 = vadd.f32 %v356_v63, %v241_v26  ;;  %v394_v2 = vadd.f32 %v393_v62, %v379_v61  ;;  %v385_v15 = vmul.f32 %v757_v32, %v757_v32  ;;  %s427_s27 = sshll.u32 %s715_s2, 4  ;;  %s428_s27 = int_to_ptr.vmem [resolvable:$true] %s427_s27 }
 0x116   :  { %s682_s28 = scalar_lea.vmem %s428_s27, 32  ;;  %p687_p2 = scmp.lt.s32.totalorder %s428_s27, %s428_s27 }
 0x117   :  { %v358_v4 = vadd.f32 %v748_v17, %v357_v0  ;;  %v395_v5 = vadd.f32 %v394_v2, %v380_v1  ;;  %v386_v17 = vmul.f32 %v583_v42, %v583_v42  ;;  %p683_p1 = scmp.ne.s32.totalorder %s428_s27, %s682_s28  ;;  %p688_p3 = scmp.lt.s32.totalorder %s682_s28, %s682_s28 }
 0x119   :  { %v396_v7 = vadd.f32 %v395_v5, %v381_v3  ;;  %v359_v8 = vadd.f32 %v752_v21, %v358_v4  ;;  %p689_p4 = por %p688_p3, %p687_p2 }
 0x11b   :  { %v360_v9 = vadd.f32 %v359_v8, %v254_v37  ;;  %v397_v11 = vadd.f32 %v396_v7, %v382_v6  ;;  %p690_p5 = pnand %p689_p4, %p683_p1 }
 0x11d   :  { %v398_v12 = vadd.f32 %v397_v11, %v383_v10  ;;  %v361_v13 = vadd.f32 %v360_v9, %v257_v49 }
 0x11f   :  { %v362_v16 = vadd.f32 %v757_v32, %v361_v13  ;;  %v399_v18 = vadd.f32 %v398_v12, %v384_v14 }
 0x121   :  { %v363_v19 = vadd.f32 %v583_v42, %v362_v16  ;;  %v400_v20 = vadd.f32 %v399_v18, %v385_v15 }
 0x123   :  { %v364_v22 = vrot.slane %v363_v19, 4  ;;  %v401_v23 = vadd.f32 %v400_v20, %v386_v17 }
 0x125   :  { %v365_v24 = vadd.f32 %v364_v22, %v363_v19  ;;  %v402_v25 = vrot.slane %v401_v23, 4 }
 0x127   :  { %v366_v21 = vrot.slane %v365_v24, 2  ;;  %v403_v26 = vadd.f32 %v402_v25, %v401_v23 }
 0x129   :  { %v367_v27 = vadd.f32 %v366_v21, %v365_v24  ;;  %v404_v28 = vrot.slane %v403_v26, 2 }
 0x12b   :  { %v368_v29 = vrot.slane %v367_v27, 1  ;;  %v405_v30 = vadd.f32 %v404_v28, %v403_v26 }
 0x12d   :  { %v369_v31 = vadd.f32 %v368_v29, %v367_v27  ;;  %v406_v33 = vrot.slane %v405_v30, 1 }
 0x12f   :  { %370 = vst [vmem:[#allocation8] sm:$0x1] %v369_v31  ;;  %v407_v32 = vadd.f32 %v406_v33, %v405_v30 }
 0x131   :  { %408 = vst [vmem:[#allocation8 + $0x1] sm:$0x1] %v407_v32 }
 0x132   :  { %693 = shalt.err (!%p690_p5)
}
 0x133   :  { %430 = dma.vmem_to_hbm [thread:$0]  %s428_s27, 32, %s784_s3, [#allocation9]  }
 0x134   :  { %706 = dma.done.wait [#allocation4], 1024  }
 0x135   :  { %707 = vsyncadd [#allocation4], 4294966272 }
 0x136   :  { %708 = dma.done.wait [#allocation9], 32  }
 0x137   :  { %709 = vsyncadd [#allocation9], 4294967264 }
 0x138   :  { %437 = vsyncpa [#allocation3], 1 }
 0x139   :  { %438 = vsyncpa [#allocation6], 1 }
 0x13a   :  { %439 = vsyncpa [#allocation4], 1 }
 0x13b   :  { %440 = vsyncpa [#allocation9], 1 }

</bundles_post_ra>
